<compile_context>
chip_gen: v7x
topology: tpu7x:2x2x1
jax: 0.10.0
libtpu: 0.0.40
codegen_flags: <defaults>
</compile_context>

<pallas_src>
import functools
import math

import jax
import jax.numpy as jnp
from jax.experimental import pallas as pl
from jax.experimental.pallas import tpu as pltpu

F32 = jnp.float32
BF16 = jnp.bfloat16


def _round_up(x, m):
    return ((x + m - 1) // m) * m


def _detect_vmem_limit():
    try:
        info = pltpu.get_tpu_info()
        cap = getattr(info, "vmem_capacity_bytes", None)
    except Exception:
        cap = None
    if cap is not None and cap >= 120 * 1024 * 1024:
        return 96 * 1024 * 1024          # v5e / v6e (128 MiB physical): allow big tiles
    return 40 * 1024 * 1024              # v7x (64 MiB physical) / unknown: keep headroom


_VMEM_LIMIT = _detect_vmem_limit()


def _cparams(*sem):
    return pltpu.CompilerParams(dimension_semantics=sem, vmem_limit_bytes=_VMEM_LIMIT)


# ----------------------------- in-kernel activations -------------------------

def _sigmoid(y):
    # numerically stable, exact (addresses review correctness concern on approx recip)
    e = jnp.exp(-jnp.abs(y))
    s = 1.0 / (1.0 + e)
    return jnp.where(y >= 0, s, 1.0 - s)


def _silu(y):
    return y * _sigmoid(y)


def _apply_act(y, act):
    if act == "none":
        return y
    if act == "gelu_tanh":                       # nn.GELU(approximate='tanh')
        c = 0.7978845608028654                   # sqrt(2/pi)
        return 0.5 * y * (1.0 + jnp.tanh(c * (y + 0.044715 * y * y * y)))
    if act == "silu":                            # nn.SiLU
        return _silu(y)
    if act == "sigmoid":
        return _sigmoid(y)
    if act == "softplus":
        return jnp.maximum(y, 0.0) + jnp.log1p(jnp.exp(-jnp.abs(y)))
    if act == "tanh01":                          # (tanh(x)+1)/2 head path
        return 0.5 * (jnp.tanh(y) + 1.0)
    raise ValueError(f"unknown act {act}")


# ----------------------------- tiled matmul kernel ---------------------------

def _mm_kernel(x_ref, w_ref, b_ref, o_ref, acc_ref, *, act):
    k = pl.program_id(2)

    @pl.when(k == 0)
    def _():
        acc_ref[...] = jnp.zeros_like(acc_ref)

    acc_ref[...] += jnp.dot(x_ref[...].astype(BF16), w_ref[...].astype(BF16),
                            preferred_element_type=F32)

    @pl.when(k == pl.num_programs(2) - 1)
    def _():
        y = acc_ref[...] + b_ref[...]
        o_ref[...] = _apply_act(y, act).astype(o_ref.dtype)


def _pick_tile(dim, prefs, align):
    for p in prefs:
        if dim >= p:
            return p
    return _round_up(dim, align)


def _pad2(a, m_tgt, n_tgt):
    m, n = a.shape
    if m == m_tgt and n == n_tgt:
        return a
    return jnp.pad(a, ((0, m_tgt - m), (0, n_tgt - n)))


def matmul_bias_act(x, w, b, act="none", out_dtype=F32):
    """(M, K) @ (K, N) + b with fused activation epilogue.
    Tiled over (M, N, K) with a f32 VMEM accumulator; bf16 MXU operands; 256/512-wide
    tiles preferred so stores are lane-dense and weight re-streaming is amortized."""
    M, K = x.shape
    N = w.shape[1]
    tm = _pick_tile(M, (512, 256), 16)
    tn = _pick_tile(N, (512, 256), 128)
    tk = _pick_tile(K, (1024, 512, 256), 128)
    Mp, Np, Kp = _round_up(M, tm), _round_up(N, tn), _round_up(K, tk)

    xp = _pad2(x, Mp, Kp)
    wp = _pad2(w, Kp, Np)
    bp = _pad2(b.astype(F32).reshape(1, N), 1, Np)

    out = pl.pallas_call(
        functools.partial(_mm_kernel, act=act),
        out_shape=jax.ShapeDtypeStruct((Mp, Np), out_dtype),
        grid=(Mp // tm, Np // tn, Kp // tk),
        in_specs=[
            pl.BlockSpec((tm, tk), lambda i, j, k: (i, k)),
            pl.BlockSpec((tk, tn), lambda i, j, k: (k, j)),
            pl.BlockSpec((1, tn), lambda i, j, k: (0, j)),
        ],
        out_specs=pl.BlockSpec((tm, tn), lambda i, j, k: (i, j)),
        scratch_shapes=[pltpu.VMEM((tm, tn), F32)],
        compiler_params=_cparams("parallel", "parallel", "arbitrary"),
    )(xp, wp, bp)
    if Mp != M or Np != N:
        out = out[:M, :N]
    return out


# ------------------- fused 3x3 conv (single K=9*Cin matmul) ------------------

def _conv3x3_kernel(x_ref, w_ref, b_ref, o_ref, *, act):
    # x_ref: (1, H+2, W+2, Cin)   w_ref: (9*Cin, tcout) bf16   o_ref: (1, H*W, tcout)
    Hp2, Wp2, Cin = x_ref.shape[1], x_ref.shape[2], x_ref.shape[3]
    H, W = Hp2 - 2, Wp2 - 2
    x = x_ref[0]
    taps = [x[dh:dh + H, dw:dw + W, :].reshape(H * W, Cin)
            for dh in range(3) for dw in range(3)]
    slab = jnp.concatenate(taps, axis=-1).astype(BF16)          # (H*W, 9*Cin)
    y = jnp.dot(slab, w_ref[...], preferred_element_type=F32) + b_ref[...]
    o_ref[0] = _apply_act(y, act).astype(o_ref.dtype)


def conv3x3_bias_act(x_nhwc, w9c, b, act, out_dtype=BF16):
    """3x3 / stride 1 / pad 1 conv with fused activation; one (H*W,9*Cin)@(9*Cin,Cout)
    matmul per (batch, Cout-tile) grid step.
    TODO(synk): tile the H axis (with 1-row halo) for very large resolutions."""
    B_, H, W, Cin = x_nhwc.shape
    Cout = w9c.shape[-1]
    if Cout > 256 and Cout % 256 == 0:
        ct = 256
    elif Cout > 256 and Cout % 128 == 0:
        ct = 128
    else:
        ct = Cout
    xp = jnp.pad(x_nhwc, ((0, 0), (1, 1), (1, 1), (0, 0)))
    out = pl.pallas_call(
        functools.partial(_conv3x3_kernel, act=act),
        out_shape=jax.ShapeDtypeStruct((B_, H * W, Cout), out_dtype),
        grid=(B_, Cout // ct),
        in_specs=[
            pl.BlockSpec((1, H + 2, W + 2, Cin), lambda i, j: (i, 0, 0, 0)),
            pl.BlockSpec((9 * Cin, ct), lambda i, j: (0, j)),
            pl.BlockSpec((1, ct), lambda i, j: (0, j)),
        ],
        out_specs=pl.BlockSpec((1, H * W, ct), lambda i, j: (i, 0, j)),
        compiler_params=_cparams("parallel", "parallel"),
    )(xp, w9c, b.astype(F32).reshape(1, Cout))
    return out.reshape(B_, H, W, Cout)


# ------------- fused Mamba inner kernel: dwconv + proj + scan + gate ----------

def _mamba_inner_kernel(xc_ref, z_ref, wconv_ref, bconv_ref, wdt_ref, wbc_ref,
                        bdt_ref, a_ref, d_ref, y_ref,
                        carry_ref, h_ref, dA_scr, hist_scr, *, K, S):
    c = pl.program_id(1)
    Lc = y_ref.shape[1]

    @pl.when(c == 0)
    def _():
        carry_ref[...] = jnp.zeros_like(carry_ref)
        h_ref[...] = jnp.zeros_like(h_ref)

    # --- causal depthwise conv (K taps) + SiLU, with (K-1)-token carry across chunks ---
    xc_raw = xc_ref[0].astype(F32)                               # (Lc, d)
    xext = jnp.concatenate([carry_ref[...], xc_raw], axis=0)     # (Lc+K-1, d)
    carry_ref[...] = xext[Lc:, :]                                # last K-1 raw tokens
    wc = wconv_ref[...]
    acc = jnp.zeros_like(xc_raw)
    for k in range(K):
        acc = acc + xext[k:k + Lc, :] * wc[k:k + 1, :]
    acc = acc + bconv_ref[...]
    xc = acc * _sigmoid(acc)                                     # SiLU

    # --- fused x_proj + dt_proj (softplus) and [B|C] projection ---
    xb = xc.astype(BF16)
    dt = jnp.dot(xb, wdt_ref[...], preferred_element_type=F32) + bdt_ref[...]
    dt = _apply_act(dt, "softplus")                              # (Lc, d)
    bc = jnp.dot(xb, wbc_ref[...], preferred_element_type=F32)   # (Lc, 2S)

    # --- bulk per-chunk precompute: dA = exp(dt*A), dBx = B * (dt*x) (per-state 2D ops) ---
    dtx = dt * xc
    a = a_ref[...]
    for k in range(S):
        dA_scr[:, k, :] = jnp.exp(dt * a[k:k + 1, :])
        hist_scr[:, k, :] = bc[:, k:k + 1] * dtx

    # --- serial recurrence over the chunk; contiguous (S, d) scratch store per step ---
    def step(t, h):
        h = dA_scr[t] * h + hist_scr[t]
        hist_scr[t] = h
        return h

    unroll = True if Lc <= 32 else 8
    h_fin = jax.lax.fori_loop(0, Lc, step, h_ref[...], unroll=unroll)
    h_ref[...] = h_fin

    # --- bulk readout y = C . h  + D*x skip, gated by silu(z); single lane-dense store ---
    y = xc * d_ref[...]
    for k in range(S):
        y = y + bc[:, S + k:S + k + 1] * hist_scr[:, k, :]
    z = z_ref[0].astype(F32)
    y = y * (z * _sigmoid(z))
    y_ref[0] = y.astype(y_ref.dtype)


def _pick_chunk(L, S, d_ip):
    # bound the two (Lc, S, d) f32 scratches to ~8 MiB
    budget = (8 * 1024 * 1024) // max(1, 8 * S * d_ip)
    cap = max(8, min(512, budget))
    if L <= cap:
        return L
    best = None
    for c in range(8, cap + 1, 8):
        if L % c == 0:
            best = c
    return best if best is not None else L   # TODO(synk): pad L for awkward lengths


def mamba_scan(p, xz):
    """Fused dwconv+SiLU -> x_proj/dt_proj -> selective scan -> D*x skip -> y*silu(z).
    xz: (B, L, 2*d_inner_p) in_proj output; returns y: (B, L, d_inner_p) bf16."""
    B_, L, _ = xz.shape
    d_ip, S, K = p["d_inner_p"], p["d_state"], p["d_conv"]
    Lc = _pick_chunk(L, S, d_ip)
    A_t = -jnp.exp(p["A_log"])                                   # (S, d_ip)
    return pl.pallas_call(
        functools.partial(_mamba_inner_kernel, K=K, S=S),
        out_shape=jax.ShapeDtypeStruct((B_, L, d_ip), BF16),
        grid=(B_, L // Lc),
        in_specs=[
            pl.BlockSpec((1, Lc, d_ip), lambda b, c: (b, c, 0)),   # xc half of xz
            pl.BlockSpec((1, Lc, d_ip), lambda b, c: (b, c, 1)),   # z half of xz
            pl.BlockSpec((K, d_ip), lambda b, c: (0, 0)),          # conv weight
            pl.BlockSpec((1, d_ip), lambda b, c: (0, 0)),          # conv bias
            pl.BlockSpec((d_ip, d_ip), lambda b, c: (0, 0)),       # composed dt weight
            pl.BlockSpec((d_ip, 2 * S), lambda b, c: (0, 0)),      # [B|C] weight
            pl.BlockSpec((1, d_ip), lambda b, c: (0, 0)),          # dt bias
            pl.BlockSpec((S, d_ip), lambda b, c: (0, 0)),          # A
            pl.BlockSpec((1, d_ip), lambda b, c: (0, 0)),          # D
        ],
        out_specs=pl.BlockSpec((1, Lc, d_ip), lambda b, c: (b, c, 0)),
        scratch_shapes=[
            pltpu.VMEM((K - 1, d_ip), F32),     # conv tail carry
            pltpu.VMEM((S, d_ip), F32),         # SSM state carry
            pltpu.VMEM((Lc, S, d_ip), F32),     # dA per chunk
            pltpu.VMEM((Lc, S, d_ip), F32),     # dBx -> h history per chunk
        ],
        compiler_params=_cparams("parallel", "arbitrary"),
    )(xz, xz, p["conv_w"], p["conv_b"].reshape(1, d_ip), p["dtc_w"], p["bc_w"],
      p["dt_proj_b"].reshape(1, d_ip), A_t, p["D"].reshape(1, d_ip))


# ----------------------------- fused residual FFN -----------------------------

def _ffn_kernel(x_ref, w1_ref, b1_ref, w2_ref, b2_ref, o_ref):
    x = x_ref[...]
    x32 = x.astype(F32)
    h = jnp.dot(x.astype(BF16), w1_ref[...], preferred_element_type=F32) + b1_ref[...]
    h = _apply_act(h, "gelu_tanh")
    y = jnp.dot(h.astype(BF16), w2_ref[...], preferred_element_type=F32) + b2_ref[...]
    o_ref[...] = (x32 + y).astype(o_ref.dtype)


def residual_ffn(p, x_nhwc):
    # TODO(synk): ResidualFFN definition not provided; assumed pointwise 2-layer MLP + residual.
    B_, H, W, C = x_nhwc.shape
    Cp = _round_up(C, 128)
    M = B_ * H * W
    tm = _pick_tile(M, (512, 256), 16)
    Mp = _round_up(M, tm)
    xf = _pad2(x_nhwc.reshape(M, C), Mp, Cp)
    w1 = _pad2(p["ffn1_w"], Cp, Cp)
    b1 = _pad2(p["ffn1_b"].reshape(1, C), 1, Cp)
    w2 = _pad2(p["ffn2_w"], Cp, Cp)
    b2 = _pad2(p["ffn2_b"].reshape(1, C), 1, Cp)
    out = pl.pallas_call(
        _ffn_kernel,
        out_shape=jax.ShapeDtypeStruct((Mp, Cp), BF16),
        grid=(Mp // tm,),
        in_specs=[
            pl.BlockSpec((tm, Cp), lambda i: (i, 0)),
            pl.BlockSpec((Cp, Cp), lambda i: (0, 0)),
            pl.BlockSpec((1, Cp), lambda i: (0, 0)),
            pl.BlockSpec((Cp, Cp), lambda i: (0, 0)),
            pl.BlockSpec((1, Cp), lambda i: (0, 0)),
        ],
        out_specs=pl.BlockSpec((tm, Cp), lambda i: (i, 0)),
        compiler_params=_cparams("parallel"),
    )(xf, w1, b1, w2, b2)
    return out[:M, :C].reshape(B_, H, W, C)


# --------------------------- composite ops / glue -----------------------------

def pixel_shuffle_nhwc(x, r):
    """nn.PixelShuffle(r) semantics, NHWC layout (channel index = c*r*r + i*r + j)."""
    B_, H, W, CR2 = x.shape
    C = CR2 // (r * r)
    x = x.reshape(B_, H, W, C, r, r)
    x = jnp.transpose(x, (0, 1, 4, 2, 5, 3))
    return x.reshape(B_, H * r, W * r, C)


def mamba_forward(p, x):
    """Mamba block: in_proj -> fused (dwconv+SiLU, proj, scan, gate) kernel -> out_proj."""
    B_, L, E = x.shape
    d_ip = p["d_inner_p"]
    xz = matmul_bias_act(x.reshape(B_ * L, E), p["in_proj_w"],
                         jnp.zeros((2 * d_ip,), F32), "none", out_dtype=BF16)
    y = mamba_scan(p, xz.reshape(B_, L, 2 * d_ip))
    out = matmul_bias_act(y.reshape(B_ * L, d_ip), p["out_proj_w"],
                          jnp.zeros((E,), F32), "none", out_dtype=BF16)
    return out.reshape(B_, L, E)


def nerv_plus_block_forward(p, x_nhwc, act):
    B_, H, W, C = x_nhwc.shape
    p1, p2, h, w = p["p1"], p["p2"], p["h"], p["w"]
    # PatchEmbed (TODO(synk): class not provided; assumed patchify + linear proj to ngf//2)
    xp = x_nhwc.reshape(B_, h, p1, w, p2, C)
    xp = jnp.transpose(xp, (0, 1, 3, 2, 4, 5)).reshape(B_ * h * w, p1 * p2 * C)
    xe = matmul_bias_act(xp, p["embed_w"], p["embed_b"], "none",
                         out_dtype=BF16).reshape(B_, h * w, -1)
    # Mamba SSM over the token sequence
    xs = mamba_forward(p["mamba"], xe)
    # unpatchify: transpose -> Linear(N, N*p1*p2) -> einsum('behwpq->behpwq') -> NHWC
    E = xs.shape[-1]
    N = h * w
    xt = jnp.transpose(xs, (0, 2, 1)).reshape(B_ * E, N)
    y = matmul_bias_act(xt, p["linear_w"], p["linear_b"], "none", out_dtype=BF16)
    y = y.reshape(B_, E, h, w, p1, p2)
    y = jnp.transpose(y, (0, 1, 2, 4, 3, 5)).reshape(B_, E, h * p1, w * p2)
    y = jnp.transpose(y, (0, 2, 3, 1))                            # NHWC
    # TODO(synk): fold the unpatchify / pixel_shuffle permutations into consumer index_maps.
    # CustomConv (3x3 conv + PixelShuffle) + activation fused into the conv epilogue.
    y = conv3x3_bias_act(y, p["conv_w"], p["conv_b"], act)
    y = pixel_shuffle_nhwc(y, p["stride"])
    # Dropout(0.0) is identity.
    return residual_ffn(p, y)


# ----------------------------- parameter init --------------------------------

def _xavier_uniform(key, shape, fan_in, fan_out):
    limit = math.sqrt(6.0 / (fan_in + fan_out))
    return jax.random.uniform(key, shape, F32, -limit, limit)


def _trunc_normal(key, shape, std=0.02):
    return std * jax.random.truncated_normal(key, -2.0, 2.0, shape, F32)


def init_mamba(key, d_model, d_state=16, d_conv=4, expand=2):
    d_inner = expand * d_model
    d_ip = _round_up(d_inner, 128)                # lane-dense inner dim (padded at init)
    dt_rank = max(1, math.ceil(d_model / 16))
    ks = jax.random.split(key, 6)
    w_x = _trunc_normal(ks[0], (d_model, d_inner))
    w_z = _trunc_normal(ks[1], (d_model, d_inner))
    in_proj = jnp.zeros((d_model, 2 * d_ip), F32)
    in_proj = in_proj.at[:, :d_inner].set(w_x).at[:, d_ip:d_ip + d_inner].set(w_z)
    conv_w = jnp.zeros((d_conv, d_ip), F32).at[:, :d_inner].set(
        _trunc_normal(ks[2], (d_conv, d_inner), std=0.1))
    x_proj = _trunc_normal(ks[3], (d_inner, dt_rank + 2 * d_state))
    dt_proj = _trunc_normal(ks[4], (dt_rank, d_inner), std=0.1)
    # x_proj -> dt_proj fused by weight composition: (x@Wx[:, :R])@Wdt == x@(Wx[:, :R]@Wdt)
    # TODO(synk): for d_inner > 128 keep the rank-R two-stage dt projection instead.
    dtc = x_proj[:, :dt_rank] @ dt_proj                           # (d_inner, d_inner)
    dtc_w = jnp.zeros((d_ip, d_ip), F32).at[:d_inner, :d_inner].set(dtc)
    bc_w = jnp.zeros((d_ip, 2 * d_state), F32).at[:d_inner, :].set(x_proj[:, dt_rank:])
    out_w = jnp.zeros((d_ip, d_model), F32).at[:d_inner, :].set(
        _trunc_normal(ks[5], (d_inner, d_model)))
    return {
        "d_inner": d_inner, "d_inner_p": d_ip, "d_state": d_state, "d_conv": d_conv,
        "in_proj_w": in_proj.astype(BF16),
        "conv_w": conv_w,
        "conv_b": jnp.zeros((d_ip,), F32),
        "dtc_w": dtc_w.astype(BF16),
        "bc_w": bc_w.astype(BF16),
        "dt_proj_b": jnp.full((d_ip,), -4.6, F32),                # softplus(.) ~ 0.01
        "A_log": jnp.log(jnp.arange(1, d_state + 1, dtype=F32))[:, None]
                 * jnp.ones((1, d_ip), F32),
        "D": jnp.ones((d_ip,), F32),
        "out_proj_w": out_w.astype(BF16),
    }


def init_nerv_block(key, resolution, patch_size, ngf, new_ngf, stride):
    H, W = resolution
    p1, p2 = patch_size
    h, w = H // p1, W // p2
    N = h * w
    embed_dim = ngf // 2
    ks = jax.random.split(key, 6)
    cout = new_ngf * stride * stride
    conv_w = _xavier_uniform(ks[3], (3, 3, embed_dim, cout),
                             fan_in=9 * embed_dim, fan_out=9 * cout)
    return {
        "p1": p1, "p2": p2, "h": h, "w": w, "stride": stride,
        "embed_w": _trunc_normal(ks[0], (p1 * p2 * ngf, embed_dim)).astype(BF16),
        "embed_b": jnp.zeros((embed_dim,), F32),
        # TODO(synk): source builds Mamba(d_model=ngf*p1*p2), which is shape-inconsistent
        # with the ngf//2-channel conv that follows; d_model=embed_dim (ngf//2) is used here.
        "mamba": init_mamba(ks[1], embed_dim),
        "linear_w": _trunc_normal(ks[2], (N, N * p1 * p2)).astype(BF16),
        "linear_b": jnp.zeros((N * p1 * p2,), F32),
        # CustomConv: Conv2d(ngf//2, new_ngf*stride^2, 3, 1, 1) + PixelShuffle(stride);
        # weights stored pre-reshaped to (9*Cin, Cout) bf16 for the single-slab matmul.
        "conv_w": conv_w.reshape(9 * embed_dim, cout).astype(BF16),
        "conv_b": jnp.zeros((cout,), F32),
        "ffn1_w": _trunc_normal(ks[4], (new_ngf, new_ngf)).astype(BF16),
        "ffn1_b": jnp.zeros((new_ngf,), F32),
        "ffn2_w": _trunc_normal(ks[5], (new_ngf, new_ngf)).astype(BF16),
        "ffn2_b": jnp.zeros((new_ngf,), F32),
    }


def generate_tuples(strides, patch_size):
    # TODO(synk): generate_tuples not provided; assumed cumulative scaling by preceding strides.
    out, c = [], 1
    for s in strides:
        out.append((patch_size[0] * c, patch_size[1] * c))
        c *= s
    return out


def init_generator(key, cfg):
    stem_dim, _stem_num = [int(v) for v in cfg["stem_dim_num"].split("_")]
    fc_h, fc_w, fc_dim = [int(v) for v in cfg["fc_hw_dim"].split("_")]
    keys = iter(jax.random.split(key, 64))
    params = {"fc_h": fc_h, "fc_w": fc_w, "fc_dim": fc_dim}
    # Stem: Gmlp (TODO(synk): Gmlp def not provided; assumed Linear -> GELU(tanh) -> Linear)
    out_feat = fc_h * fc_w * fc_dim
    params["stem"] = {
        "fc1_w": _trunc_normal(next(keys), (cfg["embed_length"], stem_dim)).astype(BF16),
        "fc1_b": jnp.zeros((stem_dim,), F32),
        "fc2_w": _trunc_normal(next(keys), (stem_dim, out_feat)).astype(BF16),
        "fc2_b": jnp.zeros((out_feat,), F32),
    }
    ngf = fc_dim
    p_sizes = generate_tuples(cfg["stride_list"], (3, 4))
    resolution = generate_tuples(cfg["stride_list"], (fc_h, fc_w))
    layers, heads = [], []
    for i, stride in enumerate(cfg["stride_list"]):
        if i == 0:
            new_ngf = int(ngf * cfg["expansion"])
        else:
            new_ngf = max(ngf // (1 if stride == 1 else cfg["reduction"]), cfg["lower_width"])
        for j in range(cfg["num_blocks"]):
            layers.append(init_nerv_block(next(keys), resolution[i], p_sizes[i],
                                          ngf, new_ngf, 1 if j else stride))
            ngf = new_ngf
        if cfg["sin_res"] and i != len(cfg["stride_list"]) - 1:
            heads.append(None)
        else:
            heads.append({"w": _xavier_uniform(next(keys), (ngf, 3),
                                               fan_in=ngf, fan_out=3).astype(BF16),
                          "b": jnp.zeros((3,), F32)})
    params["layers"] = layers
    params["heads"] = heads
    return params


# ------------------------------ Generator fwd --------------------------------

def generator_forward(params, inpt, cfg):
    b = inpt.shape[0]
    fc_h, fc_w, fc_dim = params["fc_h"], params["fc_w"], params["fc_dim"]
    stem = params["stem"]
    h = matmul_bias_act(inpt, stem["fc1_w"], stem["fc1_b"], "gelu_tanh", out_dtype=BF16)
    h = matmul_bias_act(h, stem["fc2_w"], stem["fc2_b"], "none", out_dtype=BF16)
    x = h.reshape(b, fc_dim, fc_h, fc_w)          # NCHW, matches torch .view
    x = jnp.transpose(x, (0, 2, 3, 1))            # -> NHWC for the kernels
    act = {"gelu": "gelu_tanh", "swish": "silu"}[cfg["act"]]
    out_list = []
    for layer_p, head_p in zip(params["layers"], params["heads"]):
        x = nerv_plus_block_forward(layer_p, x, act)
        if head_p is not None:
            B_, H, W, C = x.shape
            head_act = "sigmoid" if cfg["sigmoid"] else "tanh01"
            img = matmul_bias_act(x.reshape(B_ * H * W, C), head_p["w"], head_p["b"],
                                  head_act)
            img = img.reshape(B_, H, W, 3)
            out_list.append(jnp.transpose(img, (0, 3, 1, 2)))   # outputs are NCHW
    return out_list


# ----------------------------------- main ------------------------------------

if __name__ == "__main__":
    cfg = dict(
        embed_length=16,
        stem_dim_num="32_1",
        fc_hw_dim="6_8_16",
        stride_list=[2],
        expansion=1.0,
        reduction=2,
        lower_width=12,
        num_blocks=1,
        bias=True,
        norm="none",
        act="swish",
        conv_type="conv",
        sin_res=False,
        sigmoid=True,
    )
    key = jax.random.PRNGKey(0)
    pkey, ikey = jax.random.split(key)
    params = init_generator(pkey, cfg)
    inpt = jax.random.normal(ikey, (2, cfg["embed_length"]), dtype=jnp.float32)

    outs = generator_forward(params, inpt, cfg)
    outs = [jax.block_until_ready(o) for o in outs]
    assert len(outs) == 1 and outs[0].shape == (2, 3, 12, 16), outs[0].shape
    assert bool(jnp.all(jnp.isfinite(outs[0])))
    print("KERNEL_OK")
</pallas_src>

<mosaic_0001>
module attributes {stable_mosaic.version = 11 : i64} {
  func.func @_mm_kernel(%arg0: i32, %arg1: i32, %arg2: i32, %arg3: memref<16x128xf32, #tpu.memory_space<vmem>>, %arg4: memref<128x128xbf16, #tpu.memory_space<vmem>>, %arg5: memref<1x128xf32, #tpu.memory_space<vmem>>, %arg6: memref<16x128xbf16, #tpu.memory_space<vmem>>, %arg7: memref<16x128xf32, #tpu.memory_space<vmem>>) attributes {dimension_semantics = [#tpu.dimension_semantics<parallel>, #tpu.dimension_semantics<parallel>, #tpu.dimension_semantics<arbitrary>], iteration_bounds = array<i64: 1, 1, 1>, scalar_prefetch = 0 : i64, scratch_operands = 1 : i64, tpu.core_type = #tpu.core_type<tc>, window_params = [{transform_indices = @transform_0, window_bounds = array<i64: 16, 128>}, {transform_indices = @transform_1, window_bounds = array<i64: 128, 128>}, {transform_indices = @transform_2, window_bounds = array<i64: 1, 128>}, {transform_indices = @transform_3, window_bounds = array<i64: 16, 128>}]} {
    %c0_i32 = arith.constant 0 : i32
    %0 = arith.cmpi eq, %arg2, %c0_i32 : i32
    %1 = arith.extui %0 : i1 to i32
    %c0_i32_0 = arith.constant 0 : i32
    %2 = arith.cmpi ne, %1, %c0_i32_0 : i32
    scf.if %2 {
      %cst_10 = arith.constant 0.000000e+00 : f32
      %13 = vector.broadcast %cst_10 : f32 to vector<16x128xf32>
      %c0_11 = arith.constant 0 : index
      %c0_12 = arith.constant 0 : index
      %14 = vector.load %arg7[%c0_11, %c0_12] : memref<16x128xf32, #tpu.memory_space<vmem>>, vector<16x128xf32>
      tpu.vector_store %arg7[%c0_11, %c0_12], %13 {strides = array<i32>} : memref<16x128xf32, #tpu.memory_space<vmem>>, vector<16x128xf32>,
    } else {
    }
    %c0 = arith.constant 0 : index
    %c0_1 = arith.constant 0 : index
    %3 = vector.load %arg7[%c0, %c0_1] : memref<16x128xf32, #tpu.memory_space<vmem>>, vector<16x128xf32>
    %c0_2 = arith.constant 0 : index
    %c0_3 = arith.constant 0 : index
    %4 = vector.load %arg3[%c0_2, %c0_3] : memref<16x128xf32, #tpu.memory_space<vmem>>, vector<16x128xf32>
    %5 = arith.truncf %4 : vector<16x128xf32> to vector<16x128xbf16>
    %c0_4 = arith.constant 0 : index
    %c0_5 = arith.constant 0 : index
    %6 = vector.load %arg4[%c0_4, %c0_5] : memref<128x128xbf16, #tpu.memory_space<vmem>>, vector<128x128xbf16>
    %cst = arith.constant dense<0.000000e+00> : vector<16x128xf32>
    %7 = tpu.matmul %5, %6, %cst {dimension_numbers = #tpu.dot_dimension_numbers<[1], [0], [0], [1], [0, 0, 1, 1], [], []>} : vector<16x128xbf16>, vector<128x128xbf16>, vector<16x128xf32> -> vector<16x128xf32>
    %8 = arith.addf %3, %7 : vector<16x128xf32>
    %c0_6 = arith.constant 0 : index
    %c0_7 = arith.constant 0 : index
    %9 = vector.load %arg7[%c0_6, %c0_7] : memref<16x128xf32, #tpu.memory_space<vmem>>, vector<16x128xf32>
    tpu.vector_store %arg7[%c0_6, %c0_7], %8 {strides = array<i32>} : memref<16x128xf32, #tpu.memory_space<vmem>>, vector<16x128xf32>,
    %c0_i32_8 = arith.constant 0 : i32
    %10 = arith.cmpi eq, %arg2, %c0_i32_8 : i32
    %11 = arith.extui %10 : i1 to i32
    %c0_i32_9 = arith.constant 0 : i32
    %12 = arith.cmpi ne, %11, %c0_i32_9 : i32
    scf.if %12 {
      %c0_10 = arith.constant 0 : index
      %c0_11 = arith.constant 0 : index
      %13 = vector.load %arg7[%c0_10, %c0_11] : memref<16x128xf32, #tpu.memory_space<vmem>>, vector<16x128xf32>
      %c0_12 = arith.constant 0 : index
      %c0_13 = arith.constant 0 : index
      %14 = vector.load %arg5[%c0_12, %c0_13] : memref<1x128xf32, #tpu.memory_space<vmem>>, vector<1x128xf32>
      %15 = vector.broadcast %14 : vector<1x128xf32> to vector<16x128xf32>
      %16 = arith.addf %13, %15 : vector<16x128xf32>
      %cst_14 = arith.constant 5.000000e-01 : f32
      %17 = vector.broadcast %cst_14 : f32 to vector<16x128xf32>
      %18 = arith.mulf %17, %16 : vector<16x128xf32>
      %cst_15 = arith.constant 4.471500e-02 : f32
      %19 = vector.broadcast %cst_15 : f32 to vector<16x128xf32>
      %20 = arith.mulf %19, %16 : vector<16x128xf32>
      %21 = arith.mulf %20, %16 : vector<16x128xf32>
      %22 = arith.mulf %21, %16 : vector<16x128xf32>
      %23 = arith.addf %16, %22 : vector<16x128xf32>
      %cst_16 = arith.constant 0.797884583 : f32
      %24 = vector.broadcast %cst_16 : f32 to vector<16x128xf32>
      %25 = arith.mulf %24, %23 : vector<16x128xf32>
      %26 = math.tanh %25 : vector<16x128xf32>
      %cst_17 = arith.constant 1.000000e+00 : f32
      %27 = vector.broadcast %cst_17 : f32 to vector<16x128xf32>
      %28 = arith.addf %27, %26 : vector<16x128xf32>
      %29 = arith.mulf %18, %28 : vector<16x128xf32>
      %30 = arith.truncf %29 : vector<16x128xf32> to vector<16x128xbf16>
      %c0_18 = arith.constant 0 : index
      %c0_19 = arith.constant 0 : index
      %31 = vector.load %arg6[%c0_18, %c0_19] : memref<16x128xbf16, #tpu.memory_space<vmem>>, vector<16x128xbf16>
      tpu.vector_store %arg6[%c0_18, %c0_19], %30 {strides = array<i32>} : memref<16x128xbf16, #tpu.memory_space<vmem>>, vector<16x128xbf16>,
    } else {
    }
    return
  }
  func.func @transform_0(%arg0: i32, %arg1: i32, %arg2: i32) -> (i32, i32) {
    %c0_i32 = arith.constant 0 : i32
    return %arg0, %arg2 : i32, i32
  }
  func.func @transform_1(%arg0: i32, %arg1: i32, %arg2: i32) -> (i32, i32) {
    %c0_i32 = arith.constant 0 : i32
    return %arg2, %arg1 : i32, i32
  }
  func.func @transform_2(%arg0: i32, %arg1: i32, %arg2: i32) -> (i32, i32) {
    %c0_i32 = arith.constant 0 : i32
    %c0_i32_0 = arith.constant 0 : i32
    return %c0_i32, %arg1 : i32, i32
  }
  func.func @transform_3(%arg0: i32, %arg1: i32, %arg2: i32) -> (i32, i32) {
    %c0_i32 = arith.constant 0 : i32
    return %arg0, %arg1 : i32, i32
  }
}

</mosaic_0001>

<bundles_post_ra>
// kernel: tpu_custom_call.1
= control target key start
LH: loop header
LB: loop body
LE: loop exit
PB: predicated region body
PF: predicated region fallthrough
CT: control target
= control target key end

     0   :  { %8 = vsyncpa [#allocation4], 0  ;;  %s438_s0 = inlined_call_operand.hbm [shape: f32[16,128], index: 0, kind: input, shape index: {}]   ;;  %s439_s1 = inlined_call_operand.hbm [shape: bf16[128,128], index: 1, kind: input, shape index: {}]   ;;  %s440_s2 = inlined_call_operand.vmem [shape: f32[1,128], index: 2, kind: input, shape index: {}]   ;;  %s441_s3 = inlined_call_operand.hbm [shape: bf16[16,128], index: 3, kind: output, shape index: {}]  }
   0x1   :  { %9 = vsyncpa [#allocation7], 0 }
   0x2   :  { %10 = vsyncpa [#allocation5], 0  ;;  %s364_s12 = smov [#allocation3]   ;;  %s292_s16 = scalar_lea.hbm %s438_s0, 256 }
   0x3   :  { %s16_s13 = sshll.u32 %s364_s12, 4  ;;  %p293_p0 = scmp.ne.s32.totalorder %s438_s0, %s292_s16  ;;  %s17_s13 = int_to_ptr.vmem [resolvable:$true] %s16_s13 }
   0x4   :  { %p296_p1 = scmp.lt.u32.totalorder %s292_s16, %s438_s0 }
   0x6   :  { %p298_p2 = pnand %p296_p1, %p293_p0 }
   0x8   :  { %301 = shalt.err (!%p298_p2)
}
   0x9   :  { %s302_s21 = scalar_lea.vmem %s17_s13, 256  ;;  %p307_p4 = scmp.lt.s32.totalorder %s17_s13, %s17_s13 }
   0xa   :  { %p303_p3 = scmp.ne.s32.totalorder %s17_s13, %s302_s21  ;;  %p308_p5 = scmp.lt.s32.totalorder %s302_s21, %s302_s21 }
   0xc   :  { %p309_p6 = por %p308_p5, %p307_p4 }
   0xe   :  { %p310_p7 = pnand %p309_p6, %p303_p3 }
  0x10   :  { %313 = shalt.err (!%p310_p7)
}
  0x11   :  { %s365_s22 = smov 128   ;;  %s366_s23 = smov 8  }
  0x12   :  { %22 = dma.hbm_to_vmem [thread:$0]  %s438_s0, 256, %s17_s13, [#allocation4], %s365_s22, %s365_s22, %s366_s23  }
  0x13   :  { %s367_s26 = smov [#allocation6]   ;;  %s314_s30 = scalar_lea.hbm %s439_s1, 1024 }
  0x14   :  { %s28_s27 = sshll.u32 %s367_s26, 4  ;;  %p315_p8 = scmp.ne.s32.totalorder %s439_s1, %s314_s30  ;;  %s29_s27 = int_to_ptr.vmem [resolvable:$true] %s28_s27 }
  0x15   :  { %p318_p9 = scmp.lt.u32.totalorder %s314_s30, %s439_s1 }
  0x17   :  { %p320_p10 = pnand %p318_p9, %p315_p8 }
  0x19   :  { %323 = shalt.err (!%p320_p10)
}
  0x1a   :  { %s324_s8 = scalar_lea.vmem %s29_s27, 1024  ;;  %p329_p12 = scmp.lt.s32.totalorder %s29_s27, %s29_s27 }
  0x1b   :  { %p325_p11 = scmp.ne.s32.totalorder %s29_s27, %s324_s8  ;;  %p330_p13 = scmp.lt.s32.totalorder %s324_s8, %s324_s8 }
  0x1d   :  { %p331_p0 = por %p330_p13, %p329_p12 }
  0x1f   :  { %p332_p1 = pnand %p331_p0, %p325_p11 }
  0x21   :  { %335 = shalt.err (!%p332_p1)
}
  0x22   :  { %s368_s0 = smov 64   ;;  %s369_s9 = smov 4  }
  0x23   :  { %34 = dma.hbm_to_vmem [thread:$0]  %s439_s1, 1024, %s29_s27, [#allocation7], %s368_s0, %s368_s0, %s369_s9  }
  0x24   :  { %358 = dma.done.wait [#allocation4], 256  }
  0x25   :  { %359 = vsyncadd [#allocation4], 4294967040 }
  0x26   :  { %360 = dma.done.wait [#allocation7], 1024  }
  0x27   :  { %361 = vsyncadd [#allocation7], 4294966272  ;;  %v370_v0 = vmov 0.0   ;;  %vm371_vm0 = vmmov 0   ;;  %v280_v1 = vld [vmem:[#allocation6] sm:$0xff]   ;;  %v281_v2 = vld [vmem:[#allocation6 + $0x8] sm:$0xff]  }
  0x28   :  { %251 = vmatprep.subr.bf16.mxu0 %v370_v0  ;;  %267 = vmatprep.mubr.msk.bf16.mxu0 %vm371_vm0, %v370_v0  ;;  %v282_v3 = vld [vmem:[#allocation6 + $0x10] sm:$0xff]   ;;  %v283_v4 = vld [vmem:[#allocation6 + $0x18] sm:$0xff]   ;;  %v284_v5 = vld [vmem:[#allocation6 + $0x20] sm:$0xff]  }
  0x29   :  { %252 = vmatpush3.bf16.msra.mxu0 %v280_v1  ;;  %v285_v6 = vld [vmem:[#allocation6 + $0x28] sm:$0xff]   ;;  %v286_v7 = vld [vmem:[#allocation6 + $0x30] sm:$0xff]   ;;  %v287_v8 = vld [vmem:[#allocation6 + $0x38] sm:$0xff]  }
  0x2a   :  { %253 = vmatprep.subr.bf16.mxu0 %v370_v0  ;;  %v52_v9 = vld [vmem:[#allocation3] sm:$0xff]  ;;  %v53_v10 = vld [vmem:[#allocation3 + $0x8] sm:$0xff] }
  0x2b   :  { %v54_v11 = vpack.c.bf16 %v53_v10, %v52_v9  ;;  %v232_v12 = vld [vmem:[%s440_s2] ss:$0 sm:$0xff]  ;;  %s372_s2 = smov [#allocation8]  }
  0x2c   :  { %s211_s13 = sshll.u32 %s372_s2, 4  ;;  %s212_s13 = int_to_ptr.vmem [resolvable:$true] %s211_s13 }
  0x2d   :  { %254 = vmatpush3.bf16.msra.mxu0 %v281_v2  ;;  %s336_s14 = scalar_lea.vmem %s212_s13, 128  ;;  %p341_p3 = scmp.lt.s32.totalorder %s212_s13, %s212_s13 }
  0x2e   :  { %255 = vmatprep.subr.bf16.mxu0 %v370_v0  ;;  %p337_p2 = scmp.ne.s32.totalorder %s212_s13, %s336_s14  ;;  %p342_p4 = scmp.lt.s32.totalorder %s336_s14, %s336_s14 }
  0x30   :  { %p343_p5 = por %p342_p4, %p341_p3 }
  0x31   :  { %256 = vmatpush3.bf16.msra.mxu0 %v282_v3 }
  0x32   :  { %257 = vmatprep.subr.bf16.mxu0 %v370_v0  ;;  %p344_p6 = pnand %p343_p5, %p337_p2 }
  0x35   :  { %258 = vmatpush3.bf16.msra.mxu0 %v283_v4 }
  0x36   :  { %259 = vmatprep.subr.bf16.mxu0 %v370_v0 }
  0x39   :  { %260 = vmatpush3.bf16.msra.mxu0 %v284_v5 }
  0x3a   :  { %261 = vmatprep.subr.bf16.mxu0 %v370_v0 }
  0x3d   :  { %262 = vmatpush3.bf16.msra.mxu0 %v285_v6 }
  0x3e   :  { %263 = vmatprep.subr.bf16.mxu0 %v370_v0 }
  0x41   :  { %264 = vmatpush3.bf16.msra.mxu0 %v286_v7 }
  0x42   :  { %265 = vmatprep.subr.bf16.mxu0 %v370_v0 }
  0x45   :  { %266 = vmatpush3.bf16.msra.mxu0 %v287_v8 }
  0x48   :  { %268 = vmatmul.mubr.bf16.vlgmr.msra.gmra.mrb[0].mxu0 %v54_v11 }
 0x11b   :  { %v153_v13 = vpop.f32.mrb[0].mxu0 }
 0x11c   :  { %v176_v14 = vadd.f32 %v232_v12, %v153_v13  ;;  %v269_v15 = vpop.f32.mrb[1].mxu0 }
 0x11d   :  { %v156_v16 = vpop.f32.mrb[2].mxu0 }
 0x11e   :  { %v180_v17 = vmul.f32 0.044715, %v176_v14  ;;  %v177_v18 = vadd.f32 %v232_v12, %v156_v16  ;;  %v270_v19 = vpop.f32.mrb[3].mxu0  ;;  %v178_v32 = vmul.f32 0.5, %v176_v14 }
 0x120   :  { %v182_v20 = vmul.f32 %v180_v17, %v176_v14  ;;  %v181_v21 = vmul.f32 0.044715, %v177_v18  ;;  %v179_v33 = vmul.f32 0.5, %v177_v18 }
 0x122   :  { %v184_v22 = vmul.f32 %v182_v20, %v176_v14  ;;  %v183_v23 = vmul.f32 %v181_v21, %v177_v18 }
 0x124   :  { %v185_v24 = vmul.f32 %v183_v23, %v177_v18  ;;  %v186_v25 = vadd.f32 %v184_v22, %v176_v14 }
 0x126   :  { %v187_v26 = vadd.f32 %v185_v24, %v177_v18  ;;  %v188_v27 = vmul.f32 0.7978846, %v186_v25 }
 0x128   :  { %v189_v28 = vmul.f32 0.7978846, %v187_v26  ;;  %288 = vtanh.f32 %v188_v27 }
 0x12a   :  { %290 = vtanh.f32 %v189_v28 }
 0x132   :  { %v289_v29 = vpop.eup %288 }
 0x133   :  { %v192_v30 = vadd.f32 1.0, %v289_v29 }
 0x134   :  { %v291_v31 = vpop.eup %290 }
 0x135   :  { %v193_v34 = vadd.f32 1.0, %v291_v31  ;;  %v194_v35 = vmul.f32 %v192_v30, %v178_v32 }
 0x137   :  { %v195_v36 = vmul.f32 %v193_v34, %v179_v33 }
 0x139   :  { %v240_v37 = vpack.c.bf16 %v195_v36, %v194_v35 }
 0x13b   :  { %241 = vst [vmem:[#allocation8] sm:$0xff] %v240_v37  }
 0x13c   :  { %347 = shalt.err (!%p344_p6)
}
 0x13d   :  { %s348_s17 = scalar_lea.hbm %s441_s3, 128 }
 0x13e   :  { %p349_p7 = scmp.ne.s32.totalorder %s441_s3, %s348_s17  ;;  %p352_p8 = scmp.lt.u32.totalorder %s348_s17, %s441_s3 }
 0x140   :  { %p354_p9 = pnand %p352_p8, %p349_p7 }
 0x142   :  { %357 = shalt.err (!%p354_p9)
}
 0x143   :  { %217 = dma.vmem_to_hbm [thread:$0]  %s212_s13, 128, %s441_s3, [#allocation5], %s368_s0, %s368_s0, %s369_s9  }
 0x144   :  { %362 = dma.done.wait [#allocation5], 128  }
 0x145   :  { %363 = vsyncadd [#allocation5], 4294967168 }
 0x146   :  { %221 = vsyncpa [#allocation4], 1 }
 0x147   :  { %222 = vsyncpa [#allocation7], 1 }
 0x148   :  { %223 = vsyncpa [#allocation5], 1 }

</bundles_post_ra>
